<compile_context>
chip_gen: v7x
topology: tpu7x:2x2x1
jax: 0.10.0
libtpu: 0.0.40
codegen_flags: <defaults>
</compile_context>

<pallas_src>
import jax
import jax.numpy as jnp
from jax.experimental import pallas as pl
from jax.experimental.pallas import tpu as pltpu


def _copy_kernel(x_ref, o_ref):
    # Straight VMEM tile copy (HBM->VMEM->HBM is fully pipelined by BlockSpec).
    o_ref[...] = x_ref[...]


def _lane_dense_2d(total: int):
    """Pick a (rows, cols) factorization with a lane-dense (multiple-of-128) last dim."""
    for c in (4096, 2048, 1024, 512, 256, 128):
        if total % c == 0:
            return total // c, c
    # Fallback: single row; last block dim equals the full array dim, so it compiles.
    return 1, total


def pallas_squeeze(x: jax.Array, dim: int) -> jax.Array:
    """Equivalent of torch.Tensor.squeeze(dim) for a single integer dim."""
    ndim = x.ndim
    d = dim + ndim if dim < 0 else dim
    shape = x.shape

    # torch semantics: squeeze(dim) leaves the shape unchanged if shape[dim] != 1.
    if shape[d] == 1:
        out_shape = shape[:d] + shape[d + 1:]
    else:
        out_shape = shape

    total = 1
    for s in shape:
        total *= s

    # Lane-dense 2-D view of the (row-major identical) data.
    R, C = _lane_dense_2d(total)
    x2 = x.reshape(R, C)

    itemsize = jnp.dtype(x.dtype).itemsize

    # Tile the row axis so that double-buffered input + output tiles stay well
    # within VMEM on every generation (v5e/v6e 128 MiB, v7x 64 MiB physical,
    # 16/32 MiB scoped default): ~2 MiB per tile -> ~8 MiB live buffers.
    tile_budget_bytes = 2 * 1024 * 1024
    max_rows = max(1, tile_budget_bytes // (C * itemsize))
    if R <= 8:
        tr = R                                   # full extent (allowed by the (8,128) rule)
    else:
        tr = min(R, max(8, (max_rows // 8) * 8))  # multiple of 8, or == R

    grid = (pl.cdiv(R, tr),)

    tile_bytes = tr * C * itemsize
    # 2 in-buffers + 2 out-buffers, plus headroom.
    vmem_limit = int(4 * tile_bytes + (4 << 20))

    out2 = pl.pallas_call(
        _copy_kernel,
        out_shape=jax.ShapeDtypeStruct((R, C), x.dtype),
        grid=grid,
        in_specs=[pl.BlockSpec((tr, C), lambda i: (i, 0))],
        out_specs=pl.BlockSpec((tr, C), lambda i: (i, 0)),
        compiler_params=pltpu.CompilerParams(
            dimension_semantics=("parallel",),   # megacore sharding on v7x
            vmem_limit_bytes=vmem_limit,
        ),
        cost_estimate=pl.CostEstimate(
            flops=0,
            transcendentals=0,
            bytes_accessed=2 * total * itemsize,
        ),
    )(x2)

    return out2.reshape(out_shape)


class SqueezePallas:
    """Mirror of the PyTorch `Squeeze` module: forward(x) = x.squeeze(self.dim)."""

    def __init__(self, dim: int):
        self.dim = dim

    def __call__(self, x: jax.Array) -> jax.Array:
        return pallas_squeeze(x, self.dim)


if __name__ == "__main__":
    key = jax.random.PRNGKey(0)
    # Small NCHW-style input with a size-1 channel dim, squeezed at dim=1.
    x = jax.random.normal(key, (2, 1, 16, 16), dtype=jnp.float32)

    model = SqueezePallas(dim=1)
    out = model(x)
    out = jax.block_until_ready(out)

    ref = jnp.squeeze(x, axis=1)
    assert out.shape == ref.shape, (out.shape, ref.shape)
    assert jnp.array_equal(out, ref), "mismatch vs reference"

    print("KERNEL_OK")
</pallas_src>

<mosaic_0001>
module attributes {stable_mosaic.version = 11 : i64} {
  func.func @_copy_kernel(%arg0: i32, %arg1: memref<1x512xf32, #tpu.memory_space<vmem>>, %arg2: memref<1x512xf32, #tpu.memory_space<vmem>>) attributes {dimension_semantics = [#tpu.dimension_semantics<parallel>], iteration_bounds = array<i64: 1>, scalar_prefetch = 0 : i64, scratch_operands = 0 : i64, tpu.core_type = #tpu.core_type<tc>, window_params = [{transform_indices = @transform_0, window_bounds = array<i64: 1, 512>}, {transform_indices = @transform_1, window_bounds = array<i64: 1, 512>}]} {
    %c0 = arith.constant 0 : index
    %c0_0 = arith.constant 0 : index
    %0 = vector.load %arg1[%c0, %c0_0] : memref<1x512xf32, #tpu.memory_space<vmem>>, vector<1x512xf32>
    %c0_1 = arith.constant 0 : index
    %c0_2 = arith.constant 0 : index
    %1 = vector.load %arg2[%c0_1, %c0_2] : memref<1x512xf32, #tpu.memory_space<vmem>>, vector<1x512xf32>
    tpu.vector_store %arg2[%c0_1, %c0_2], %0 {strides = array<i32>} : memref<1x512xf32, #tpu.memory_space<vmem>>, vector<1x512xf32>,
    return
  }
  func.func @transform_0(%arg0: i32) -> (i32, i32) {
    %c0_i32 = arith.constant 0 : i32
    %c0_i32_0 = arith.constant 0 : i32
    return %arg0, %c0_i32 : i32, i32
  }
  func.func @transform_1(%arg0: i32) -> (i32, i32) {
    %c0_i32 = arith.constant 0 : i32
    %c0_i32_0 = arith.constant 0 : i32
    return %arg0, %c0_i32 : i32, i32
  }
}

</mosaic_0001>

<bundles_post_ra>
// kernel: tpu_custom_call.1
= control target key start
LH: loop header
LB: loop body
LE: loop exit
PB: predicated region body
PF: predicated region fallthrough
CT: control target
= control target key end

     0   :  { %6 = vsyncpa [#allocation3], 0  ;;  %s128_s0 = inlined_call_operand.hbm [shape: f32[1,512], index: 0, kind: input, shape index: {}]   ;;  %s129_s1 = inlined_call_operand.hbm [shape: f32[1,512], index: 1, kind: output, shape index: {}]  }
   0x1   :  { %7 = vsyncpa [#allocation4], 0  ;;  %s92_s6 = smov [#allocation2]   ;;  %s44_s10 = scalar_lea.hbm %s128_s0, 64 }
   0x2   :  { %s14_s7 = sshll.u32 %s92_s6, 4  ;;  %p45_p0 = scmp.ne.s32.totalorder %s128_s0, %s44_s10  ;;  %s15_s7 = int_to_ptr.vmem [resolvable:$true] %s14_s7 }
   0x3   :  { %p48_p1 = scmp.lt.u32.totalorder %s44_s10, %s128_s0 }
   0x5   :  { %p50_p2 = pnand %p48_p1, %p45_p0 }
   0x7   :  { %53 = shalt.err (!%p50_p2)
}
   0x8   :  { %s54_s15 = scalar_lea.vmem %s15_s7, 64  ;;  %p59_p4 = scmp.lt.s32.totalorder %s15_s7, %s15_s7 }
   0x9   :  { %p55_p3 = scmp.ne.s32.totalorder %s15_s7, %s54_s15  ;;  %p60_p5 = scmp.lt.s32.totalorder %s54_s15, %s54_s15 }
   0xb   :  { %p61_p6 = por %p60_p5, %p59_p4 }
   0xd   :  { %p62_p7 = pnand %p61_p6, %p55_p3 }
   0xf   :  { %65 = shalt.err (!%p62_p7)
}
  0x10   :  { %17 = dma.hbm_to_vmem [thread:$0]  %s128_s0, 64, %s15_s7, [#allocation3]  }
  0x11   :  { %88 = dma.done.wait [#allocation3], 64  }
  0x12   :  { %89 = vsyncadd [#allocation3], 4294967232  ;;  %v22_v0 = vlaneseq  ;;  %s93_s18 = smov [#allocation5]   ;;  %v21_v1 = vld [vmem:[#allocation2] sm:$0xf] }
  0x13   :  { %s33_s19 = sshll.u32 %s93_s18, 4  ;;  %s34_s19 = int_to_ptr.vmem [resolvable:$true] %s33_s19 }
  0x14   :  { %vm24_vm0 = vcmp.lt.s32.totalorder %v22_v0, 512  ;;  %s66_s20 = scalar_lea.vmem %s34_s19, 64  ;;  %p71_p9 = scmp.lt.s32.totalorder %s34_s19, %s34_s19 }
  0x15   :  { %26 = vst.msk [vmem:[#allocation5] sm:$0xf] %vm24_vm0, %v21_v1  ;;  %p67_p8 = scmp.ne.s32.totalorder %s34_s19, %s66_s20  ;;  %p72_p10 = scmp.lt.s32.totalorder %s66_s20, %s66_s20 }
  0x17   :  { %p73_p11 = por %p72_p10, %p71_p9 }
  0x19   :  { %p74_p12 = pnand %p73_p11, %p67_p8 }
  0x1b   :  { %77 = shalt.err (!%p74_p12)
}
  0x1c   :  { %s78_s0 = scalar_lea.hbm %s129_s1, 64 }
  0x1d   :  { %p79_p13 = scmp.ne.s32.totalorder %s129_s1, %s78_s0  ;;  %p82_p0 = scmp.lt.u32.totalorder %s78_s0, %s129_s1 }
  0x1f   :  { %p84_p1 = pnand %p82_p0, %p79_p13 }
  0x21   :  { %87 = shalt.err (!%p84_p1)
}
  0x22   :  { %36 = dma.vmem_to_hbm [thread:$0]  %s34_s19, 64, %s129_s1, [#allocation4]  }
  0x23   :  { %90 = dma.done.wait [#allocation4], 64  }
  0x24   :  { %91 = vsyncadd [#allocation4], 4294967232 }
  0x25   :  { %40 = vsyncpa [#allocation3], 1 }
  0x26   :  { %41 = vsyncpa [#allocation4], 1 }

</bundles_post_ra>
